<compile_context>
chip_gen: v7x
topology: tpu7x:2x2x1
jax: 0.10.0
libtpu: 0.0.40
codegen_flags: <defaults>
</compile_context>

<pallas_src>
import jax
import jax.numpy as jnp
from jax.experimental import pallas as pl
from jax.experimental.pallas import tpu as pltpu

LANE = 128
SUBLANE = 8


def _round_up(x, m):
    return (x + m - 1) // m * m


def _default_k_granularity(hid):
    # v6e/v7x MXUs are 256 deep -> pad the fc2 contraction (hidden) to 256 when the
    # relative overhead is small; v5e's MXU is 128 deep so 128 alignment suffices there.
    if hid < 256:
        return 128
    try:
        kind = jax.devices()[0].device_kind.lower()
    except Exception:
        return 128
    return 128 if "v5" in kind else 256


def mlp_kernel(x_ref, w1_ref, b1_ref, w2_ref, b2_ref, o_ref, acc_ref):
    k = pl.program_id(1)

    @pl.when(k == 0)
    def _init():
        acc_ref[...] = jnp.zeros_like(acc_ref)

    # In-kernel bf16 cast of the activation tile (VPU); saves a separate XLA
    # pass (read+write) over x in HBM compared to casting in the wrapper.
    xb = x_ref[...].astype(w1_ref.dtype)

    # fc1 slab: (tile_b, in) @ (in, tile_k) -> f32 accumulate on the MXU.
    h = jnp.dot(xb, w1_ref[...], preferred_element_type=jnp.float32)
    # bias + ReLU in f32 (VPU).  ReLU is per-hidden-element, so per-slab is exact.
    h = jnp.maximum(h + b1_ref[...], 0.0)

    # fc2 slab: (tile_b, tile_k) @ (tile_k, out_p) accumulated in f32.
    acc_ref[...] += jnp.dot(h.astype(w2_ref.dtype), w2_ref[...],
                            preferred_element_type=jnp.float32)

    @pl.when(k == pl.num_programs(1) - 1)
    def _finalize():
        z = acc_ref[...] + b2_ref[...]
        # sigmoid(z) = 0.5 * tanh(0.5 * z) + 0.5 : one EUP push per element,
        # result strictly in [0, 1].
        o_ref[...] = (0.5 * jnp.tanh(0.5 * z) + 0.5).astype(o_ref.dtype)


def prepare_params(w1, b1, w2, b2, *, compute_dtype=jnp.bfloat16, k_granularity=None):
    """One-time parameter prep (torch nn.Linear layout in, TPU-friendly layout out).

    w1: (hidden, input), b1: (hidden,), w2: (output, hidden), b2: (output,).
    Returns pre-transposed, lane/contraction-padded params:
      W1^T (in, hid_p), W2^T (hid_p, out_p) in `compute_dtype`,
      biases as (1, pad) f32, plus the true output size.
    Do this at parameter-load time, NOT per forward call.
    """
    hid, in_size = w1.shape
    out_size = w2.shape[0]
    if k_granularity is None:
        k_granularity = _default_k_granularity(hid)
    hid_p = _round_up(hid, k_granularity)
    out_p = _round_up(out_size, LANE)

    w1_t = jnp.zeros((in_size, hid_p), compute_dtype).at[:, :hid].set(
        w1.T.astype(compute_dtype))
    w2_t = jnp.zeros((hid_p, out_p), compute_dtype).at[:hid, :out_size].set(
        w2.T.astype(compute_dtype))
    b1_p = jnp.zeros((1, hid_p), jnp.float32).at[0, :hid].set(b1.astype(jnp.float32))
    b2_p = jnp.zeros((1, out_p), jnp.float32).at[0, :out_size].set(b2.astype(jnp.float32))
    # TODO(synk): optionally pad in_size (fc1 contraction) to 256 on v6e/v7x when the
    # overhead is small; skipped here because it would require a wrapper-side pad pass
    # over x in HBM, which this design deliberately avoids.
    return (w1_t, b1_p, w2_t, b2_p, out_size)


def two_layers_mlp(x, params, *, tile_b=None, tile_k=None, out_dtype=jnp.float32):
    """x: (B, input_size) f32.  params: output of prepare_params.
    Returns (B, output_size) in out_dtype (f32 default; bf16 halves output HBM
    writeback on v6e/v7x if downstream accepts it)."""
    w1_t, b1_p, w2_t, b2_p, out_size = params
    B, in_size = x.shape
    hid_p = w1_t.shape[1]
    out_p = w2_t.shape[1]
    w_itemsize = jnp.dtype(w1_t.dtype).itemsize

    # Batch tile: cap at 256 (the live (tile_b, tile_k) f32 intermediate is the vreg /
    # VMEM hog); guarantee >= 2 batch steps when B >= 16 so the "parallel" axis can
    # shard across v7x's two TensorCores.  No explicit padding of x: Pallas masks the
    # ragged edge, pad rows are row-independent and never stored.
    if tile_b is None:
        if B >= 16:
            tile_b = min(_round_up(pl.cdiv(B, 2), SUBLANE), 256)
        else:
            tile_b = _round_up(B, SUBLANE)
    tile_b = _round_up(tile_b, SUBLANE)

    # Contraction (hidden) tile: whole hidden if small, else a <=1024 divisor so only
    # one weight slab is resident per step (bounded VMEM on v7x's 64 MiB).
    if tile_k is None:
        if hid_p <= 1024:
            tile_k = hid_p
        else:
            tile_k = next(c for c in (1024, 512, 256, 128) if hid_p % c == 0)

    n_b = pl.cdiv(B, tile_b)
    n_k = hid_p // tile_k
    grid = (n_b, n_k)

    # Invariant blocks (constant index_map) -> single-buffered, halving their VMEM.
    def wspec(shape, imap, invariant):
        if invariant:
            return pl.BlockSpec(shape, imap, pipeline_mode=pl.Buffered(1))
        return pl.BlockSpec(shape, imap)

    in_specs = [
        pl.BlockSpec((tile_b, in_size), lambda i, k: (i, 0)),      # x tile (f32, cast in kernel)
        wspec((in_size, tile_k), lambda i, k: (0, k), n_k == 1),   # W1^T slab
        wspec((1, tile_k),       lambda i, k: (0, k), n_k == 1),   # b1 slab (f32)
        wspec((tile_k, out_p),   lambda i, k: (k, 0), n_k == 1),   # W2^T slab
        wspec((1, out_p),        lambda i, k: (0, 0), True),       # b2 (f32), always invariant
    ]
    out_specs = pl.BlockSpec((tile_b, out_p), lambda i, k: (i, 0))

    # Explicit VMEM budget: weight slabs x buffer count + pipelined x/out tiles +
    # accumulator + the live f32 fc1 intermediate, with ~25% headroom.
    n_wbuf = 1 if n_k == 1 else 2
    vmem_need = (
        2 * tile_b * in_size * 4                       # x tile, double-buffered (f32)
        + n_wbuf * (in_size * tile_k * w_itemsize      # W1^T slab
                    + tile_k * 4                       # b1 slab
                    + tile_k * out_p * w_itemsize)     # W2^T slab
        + out_p * 4                                    # b2 (single-buffered)
        + 2 * tile_b * out_p * jnp.dtype(out_dtype).itemsize   # out tile, double-buffered
        + tile_b * out_p * 4                           # f32 accumulator scratch
        + tile_b * tile_k * 4                          # live fc1 intermediate (f32)
    )
    vmem_limit = min(max(int(vmem_need * 1.25), 16 * 1024 * 1024), 128 * 1024 * 1024)

    w_reads = 1 if n_k == 1 else n_b   # weights re-streamed per batch tile when k-tiled
    bytes_accessed = int(
        B * in_size * x.dtype.itemsize
        + w_reads * (w1_t.size * w_itemsize + w2_t.size * w_itemsize
                     + b1_p.size * 4 + b2_p.size * 4)
        + B * out_p * jnp.dtype(out_dtype).itemsize)
    cost = pl.CostEstimate(
        flops=2 * B * (in_size * hid_p + hid_p * out_p),
        transcendentals=B * out_p,
        bytes_accessed=bytes_accessed)

    out = pl.pallas_call(
        mlp_kernel,
        out_shape=jax.ShapeDtypeStruct((B, out_p), out_dtype),
        grid_spec=pltpu.PrefetchScalarGridSpec(
            num_scalar_prefetch=0,
            grid=grid,
            in_specs=in_specs,
            out_specs=out_specs,
            scratch_shapes=[pltpu.VMEM((tile_b, out_p), jnp.float32)],
        ),
        compiler_params=pltpu.CompilerParams(
            # batch axis parallel (megacore on v7x), contraction axis arbitrary (last).
            dimension_semantics=("parallel", "arbitrary"),
            vmem_limit_bytes=vmem_limit,
        ),
        cost_estimate=cost,
    )(x, w1_t, b1_p, w2_t, b2_p)

    return out[:, :out_size]


if __name__ == "__main__":
    # Small shapes consistent with the module: batch=16, input=32, hidden=64, output=16.
    B, INPUT, HIDDEN, OUTPUT = 16, 32, 64, 16

    key = jax.random.PRNGKey(0)
    kx, kw1, kb1, kw2, kb2 = jax.random.split(key, 5)

    x = jax.random.normal(kx, (B, INPUT), dtype=jnp.float32)
    # Deterministic synthetic params in torch nn.Linear layout: weight (out, in), bias (out,)
    w1 = jax.random.normal(kw1, (HIDDEN, INPUT), dtype=jnp.float32) * 0.1
    b1 = jax.random.normal(kb1, (HIDDEN,), dtype=jnp.float32) * 0.1
    w2 = jax.random.normal(kw2, (OUTPUT, HIDDEN), dtype=jnp.float32) * 0.1
    b2 = jax.random.normal(kb2, (OUTPUT,), dtype=jnp.float32) * 0.1

    # One-time param prep (pre-transpose + pad + bf16 cast), then the kernel call.
    params = prepare_params(w1, b1, w2, b2)
    out = jax.block_until_ready(two_layers_mlp(x, params))

    # Pure-JAX f32 reference of the forward semantics.  Tolerance absorbs the bf16
    # MXU inputs (accumulation is f32; sigmoid-via-tanh is exact in f32).
    ref = jax.nn.sigmoid(jnp.maximum(x @ w1.T + b1, 0.0) @ w2.T + b2)
    assert out.shape == (B, OUTPUT)
    assert jnp.allclose(out, ref, atol=2e-2, rtol=2e-2), "mismatch vs reference"

    print("KERNEL_OK")
</pallas_src>

<mosaic_0001>
module attributes {stable_mosaic.version = 11 : i64} {
  func.func @mlp_kernel(%arg0: i32, %arg1: i32, %arg2: memref<8x32xf32, #tpu.memory_space<vmem>>, %arg3: memref<32x128xbf16, #tpu.memory_space<vmem>>, %arg4: memref<1x128xf32, #tpu.memory_space<vmem>>, %arg5: memref<128x128xbf16, #tpu.memory_space<vmem>>, %arg6: memref<1x128xf32, #tpu.memory_space<vmem>>, %arg7: memref<8x128xf32, #tpu.memory_space<vmem>>, %arg8: memref<8x128xf32, #tpu.memory_space<vmem>>) attributes {dimension_semantics = [#tpu.dimension_semantics<parallel>, #tpu.dimension_semantics<arbitrary>], iteration_bounds = array<i64: 2, 1>, scalar_prefetch = 0 : i64, scratch_operands = 1 : i64, tpu.core_type = #tpu.core_type<tc>, window_params = [{transform_indices = @transform_0, window_bounds = array<i64: 8, 32>}, {pipeline_mode = #tpu.pipeline_mode<synchronous>, transform_indices = @transform_1, window_bounds = array<i64: 32, 128>}, {pipeline_mode = #tpu.pipeline_mode<synchronous>, transform_indices = @transform_2, window_bounds = array<i64: 1, 128>}, {pipeline_mode = #tpu.pipeline_mode<synchronous>, transform_indices = @transform_3, window_bounds = array<i64: 128, 128>}, {pipeline_mode = #tpu.pipeline_mode<synchronous>, transform_indices = @transform_4, window_bounds = array<i64: 1, 128>}, {transform_indices = @transform_5, window_bounds = array<i64: 8, 128>}]} {
    %c0_i32 = arith.constant 0 : i32
    %0 = arith.cmpi eq, %arg1, %c0_i32 : i32
    %1 = arith.extui %0 : i1 to i32
    %c0_i32_0 = arith.constant 0 : i32
    %2 = arith.cmpi ne, %1, %c0_i32_0 : i32
    scf.if %2 {
      %cst_16 = arith.constant 0.000000e+00 : f32
      %21 = vector.broadcast %cst_16 : f32 to vector<8x128xf32>
      %c0_17 = arith.constant 0 : index
      %c0_18 = arith.constant 0 : index
      %22 = vector.load %arg8[%c0_17, %c0_18] : memref<8x128xf32, #tpu.memory_space<vmem>>, vector<8x128xf32>
      tpu.vector_store %arg8[%c0_17, %c0_18], %21 {strides = array<i32>} : memref<8x128xf32, #tpu.memory_space<vmem>>, vector<8x128xf32>,
    } else {
    }
    %c0 = arith.constant 0 : index
    %c0_1 = arith.constant 0 : index
    %3 = vector.load %arg2[%c0, %c0_1] : memref<8x32xf32, #tpu.memory_space<vmem>>, vector<8x32xf32>
    %4 = arith.truncf %3 : vector<8x32xf32> to vector<8x32xbf16>
    %c0_2 = arith.constant 0 : index
    %c0_3 = arith.constant 0 : index
    %5 = vector.load %arg3[%c0_2, %c0_3] : memref<32x128xbf16, #tpu.memory_space<vmem>>, vector<32x128xbf16>
    %cst = arith.constant dense<0.000000e+00> : vector<8x128xf32>
    %6 = tpu.matmul %4, %5, %cst {dimension_numbers = #tpu.dot_dimension_numbers<[1], [0], [0], [1], [0, 0, 1, 1], [], []>} : vector<8x32xbf16>, vector<32x128xbf16>, vector<8x128xf32> -> vector<8x128xf32>
    %c0_4 = arith.constant 0 : index
    %c0_5 = arith.constant 0 : index
    %7 = vector.load %arg4[%c0_4, %c0_5] : memref<1x128xf32, #tpu.memory_space<vmem>>, vector<1x128xf32>
    %8 = vector.broadcast %7 : vector<1x128xf32> to vector<8x128xf32>
    %9 = arith.addf %6, %8 : vector<8x128xf32>
    %cst_6 = arith.constant 0.000000e+00 : f32
    %10 = vector.broadcast %cst_6 : f32 to vector<8x128xf32>
    %11 = arith.maximumf %9, %10 : vector<8x128xf32>
    %c0_7 = arith.constant 0 : index
    %c0_8 = arith.constant 0 : index
    %12 = vector.load %arg8[%c0_7, %c0_8] : memref<8x128xf32, #tpu.memory_space<vmem>>, vector<8x128xf32>
    %13 = arith.truncf %11 : vector<8x128xf32> to vector<8x128xbf16>
    %c0_9 = arith.constant 0 : index
    %c0_10 = arith.constant 0 : index
    %14 = vector.load %arg5[%c0_9, %c0_10] : memref<128x128xbf16, #tpu.memory_space<vmem>>, vector<128x128xbf16>
    %cst_11 = arith.constant dense<0.000000e+00> : vector<8x128xf32>
    %15 = tpu.matmul %13, %14, %cst_11 {dimension_numbers = #tpu.dot_dimension_numbers<[1], [0], [0], [1], [0, 0, 1, 1], [], []>} : vector<8x128xbf16>, vector<128x128xbf16>, vector<8x128xf32> -> vector<8x128xf32>
    %16 = arith.addf %12, %15 : vector<8x128xf32>
    %c0_12 = arith.constant 0 : index
    %c0_13 = arith.constant 0 : index
    %17 = vector.load %arg8[%c0_12, %c0_13] : memref<8x128xf32, #tpu.memory_space<vmem>>, vector<8x128xf32>
    tpu.vector_store %arg8[%c0_12, %c0_13], %16 {strides = array<i32>} : memref<8x128xf32, #tpu.memory_space<vmem>>, vector<8x128xf32>,
    %c0_i32_14 = arith.constant 0 : i32
    %18 = arith.cmpi eq, %arg1, %c0_i32_14 : i32
    %19 = arith.extui %18 : i1 to i32
    %c0_i32_15 = arith.constant 0 : i32
    %20 = arith.cmpi ne, %19, %c0_i32_15 : i32
    scf.if %20 {
      %c0_16 = arith.constant 0 : index
      %c0_17 = arith.constant 0 : index
      %21 = vector.load %arg8[%c0_16, %c0_17] : memref<8x128xf32, #tpu.memory_space<vmem>>, vector<8x128xf32>
      %c0_18 = arith.constant 0 : index
      %c0_19 = arith.constant 0 : index
      %22 = vector.load %arg6[%c0_18, %c0_19] : memref<1x128xf32, #tpu.memory_space<vmem>>, vector<1x128xf32>
      %23 = vector.broadcast %22 : vector<1x128xf32> to vector<8x128xf32>
      %24 = arith.addf %21, %23 : vector<8x128xf32>
      %cst_20 = arith.constant 5.000000e-01 : f32
      %25 = vector.broadcast %cst_20 : f32 to vector<8x128xf32>
      %26 = arith.mulf %25, %24 : vector<8x128xf32>
      %27 = math.tanh %26 : vector<8x128xf32>
      %cst_21 = arith.constant 5.000000e-01 : f32
      %28 = vector.broadcast %cst_21 : f32 to vector<8x128xf32>
      %29 = arith.mulf %28, %27 : vector<8x128xf32>
      %cst_22 = arith.constant 5.000000e-01 : f32
      %30 = vector.broadcast %cst_22 : f32 to vector<8x128xf32>
      %31 = arith.addf %29, %30 : vector<8x128xf32>
      %c0_23 = arith.constant 0 : index
      %c0_24 = arith.constant 0 : index
      %32 = vector.load %arg7[%c0_23, %c0_24] : memref<8x128xf32, #tpu.memory_space<vmem>>, vector<8x128xf32>
      tpu.vector_store %arg7[%c0_23, %c0_24], %31 {strides = array<i32>} : memref<8x128xf32, #tpu.memory_space<vmem>>, vector<8x128xf32>,
    } else {
    }
    return
  }
  func.func @transform_0(%arg0: i32, %arg1: i32) -> (i32, i32) {
    %c0_i32 = arith.constant 0 : i32
    %c0_i32_0 = arith.constant 0 : i32
    return %arg0, %c0_i32 : i32, i32
  }
  func.func @transform_1(%arg0: i32, %arg1: i32) -> (i32, i32) {
    %c0_i32 = arith.constant 0 : i32
    %c0_i32_0 = arith.constant 0 : i32
    return %c0_i32, %arg1 : i32, i32
  }
  func.func @transform_2(%arg0: i32, %arg1: i32) -> (i32, i32) {
    %c0_i32 = arith.constant 0 : i32
    %c0_i32_0 = arith.constant 0 : i32
    return %c0_i32, %arg1 : i32, i32
  }
  func.func @transform_3(%arg0: i32, %arg1: i32) -> (i32, i32) {
    %c0_i32 = arith.constant 0 : i32
    %c0_i32_0 = arith.constant 0 : i32
    return %arg1, %c0_i32 : i32, i32
  }
  func.func @transform_4(%arg0: i32, %arg1: i32) -> (i32, i32) {
    %c0_i32 = arith.constant 0 : i32
    %c0_i32_0 = arith.constant 0 : i32
    %c0_i32_1 = arith.constant 0 : i32
    return %c0_i32, %c0_i32_0 : i32, i32
  }
  func.func @transform_5(%arg0: i32, %arg1: i32) -> (i32, i32) {
    %c0_i32 = arith.constant 0 : i32
    %c0_i32_0 = arith.constant 0 : i32
    return %arg0, %c0_i32 : i32, i32
  }
}

</mosaic_0001>

<bundles_post_ra>
// kernel: tpu_custom_call.1
= control target key start
LH: loop header
LB: loop body
LE: loop exit
PB: predicated region body
PF: predicated region fallthrough
CT: control target
= control target key end

     0   :  { %10 = vsyncpa [#allocation4], 0  ;;  %s1281_s0 = inlined_call_operand.hbm [shape: f32[16,32], index: 0, kind: input, shape index: {}]   ;;  %s1282_s1 = inlined_call_operand.hbm [shape: bf16[32,128], index: 1, kind: input, shape index: {}]   ;;  %s1283_s2 = inlined_call_operand.vmem [shape: f32[1,128], index: 2, kind: input, shape index: {}]   ;;  %s1284_s3 = inlined_call_operand.hbm [shape: bf16[128,128], index: 3, kind: input, shape index: {}]   ;;  %s1285_s4 = inlined_call_operand.vmem [shape: f32[1,128], index: 4, kind: input, shape index: {}]   ;;  %s1286_s5 = inlined_call_operand.hbm [shape: f32[16,128], index: 5, kind: output, shape index: {}]  }
   0x1   :  { %12 = vsyncpa [#allocation4 + $0x1], 0 }
   0x2   :  { %13 = vsyncpa [#allocation7], 0 }
   0x3   :  { %14 = vsyncpa [#allocation5], 0 }
   0x4   :  { %16 = vsyncpa [#allocation5 + $0x1], 0  ;;  %s1021_s18 = smov 0   ;;  %s1023_s19 = smov 0  }
   0x5   :  { %s1025_s20 = smov 0   ;;  %s1027_s21 = smov 0  }
   0x6   :  { %s1029_s22 = smov 0   ;;  %s1031_s23 = smov 0  }
   0x7 LB: > { %s639_s24 = sadd.s32 4294967295, %s981_s23   ;;  %s640_s25 = sadd.s32 4294967294, %s981_s23   ;;  %s981_s23 = sphi %s1031_s23, %s22_s23   ;;  %s977_s22 = sphi %s1029_s22, %s1308_s22   ;;  %s973_s21 = sphi %s1027_s21, %s1307_s21   ;;  %s969_s20 = sphi %s1025_s20, %s1306_s20   ;;  %s965_s19 = sphi %s1023_s19, %s1305_s19   ;;  %s961_s18 = sphi %s1021_s18, %s1304_s18  }
   0x8   : > { %p54_p0 = scmp.ne.s32.totalorder %s965_s19, %s961_s18  ;;  %p1055_p1 = scmp.eq.s32.totalorder %s639_s24, 0 }
   0x9   : > { %p1059_p2 = scmp.eq.s32.totalorder %s639_s24, 1  ;;  %p183_p3 = scmp.eq.s32.totalorder %s640_s25, 1 }
   0xa   : > { %s1291_s26 = scalar_select %p1055_p1, 1, 0 }
   0xb   : > { %p1065_p4 = por %p1055_p1, %p54_p0  ;;  %p641_p5 = scmp.ge.s32.totalorder %s981_s23, 1 }
   0xc   : > { %p1070_p6 = por %p183_p3, %p54_p0  ;;  %p190_p7 = scmp.lt.s32.totalorder %s981_s23, 3 }
   0xd   : > { %s1293_s28 = scalar_select %p1065_p4, 1, 0 }
   0xe   : > { %s1294_s29 = scalar_select %p1070_p6, 1, 0 }
   0xf   : > { %p1075_p8 = pnand %p641_p5, %p190_p7  ;;  %s983_s6 = smov [#allocation6]  }
  0x10   : > { %s204_s7 = sshll.u32 %s983_s6, 4  ;;  %s984_s9 = smov [#allocation8]   ;;  %s1079_s7 = int_to_ptr.vmem [resolvable:$true] %s204_s7 }
  0x11   : > { %p722_p9 = pneg %p1075_p8  ;;  %s226_s10 = sshll.u32 %s984_s9, 4  ;;  %s1090_s10 = int_to_ptr.vmem [resolvable:$true] %s226_s10 }
  0x12   : > { %s809_s13 = scalar_lea.hbm %s1282_s1, 256 }
  0x13   : > { %p1086_p11 = pnand %p722_p9, %p1055_p1  ;;  %p810_p12 = scmp.ne.s32.totalorder %s1282_s1, %s809_s13 }
  0x14   : > { %p816_p5 = scmp.lt.u32.totalorder %s809_s13, %s1282_s1 }
  0x15   : > { %p811_p13 = pneg %p1086_p11 }
  0x17   : > { %p812_p0 = pnand %p811_p13, %p810_p12 }
  0x19   : > { %p813_p3 = pneg %p812_p0 }
  0x1b   : > { %p818_p7 = pnand %p816_p5, %p813_p3 }
  0x1d   : > { %821 = shalt.err (!%p818_p7)
}
  0x1e   : > { %s822_s24 = scalar_lea.vmem %s1079_s7, 256  ;;  %p830_p1 = scmp.lt.s32.totalorder %s1079_s7, %s1079_s7 }
  0x1f   : > { %p823_p9 = scmp.ne.s32.totalorder %s1079_s7, %s822_s24  ;;  %p831_p12 = scmp.lt.s32.totalorder %s822_s24, %s822_s24 }
  0x21   : > { %p825_p10 = pnand %p823_p9, %p811_p13  ;;  %p832_p0 = por %p831_p12, %p830_p1 }
  0x23   : > { %p826_p6 = pneg %p825_p10 }
  0x25   : > { %p833_p4 = pnand %p832_p0, %p826_p6 }
  0x27   : > { %836 = shalt.err (!%p833_p4)
}
  0x28   : > { %s985_s25 = smov 64   ;;  %s986_s6 = smov 4  }
  0x29   : > { %725 = dma.hbm_to_vmem [thread:$0]  (!%p1086_p11), %s1282_s1, 256, %s1079_s7, [#allocation7], %s985_s25, %s985_s25, %s986_s6  }
  0x2a   : > { %s837_s14 = scalar_lea.hbm %s1284_s3, 1024 }
  0x2b   : > { %p838_p1 = scmp.ne.s32.totalorder %s1284_s3, %s837_s14  ;;  %p844_p10 = scmp.lt.u32.totalorder %s837_s14, %s1284_s3 }
  0x2d   : > { %p840_p4 = pnand %p838_p1, %p811_p13 }
  0x2f   : > { %p841_p6 = pneg %p840_p4 }
  0x31   : > { %p846_p3 = pnand %p844_p10, %p841_p6 }
  0x33   : > { %849 = shalt.err (!%p846_p3)
}
  0x34   : > { %s850_s7 = scalar_lea.vmem %s1090_s10, 1024  ;;  %p858_p12 = scmp.lt.s32.totalorder %s1090_s10, %s1090_s10 }
  0x35   : > { %p851_p5 = scmp.ne.s32.totalorder %s1090_s10, %s850_s7  ;;  %p859_p0 = scmp.lt.s32.totalorder %s850_s7, %s850_s7 }
  0x37   : > { %p853_p7 = pnand %p851_p5, %p811_p13  ;;  %p860_p1 = por %p859_p0, %p858_p12 }
  0x39   : > { %p854_p9 = pneg %p853_p7 }
  0x3b   : > { %p861_p4 = pnand %p860_p1, %p854_p9 }
  0x3d   : > { %864 = shalt.err (!%p861_p4)
}
  0x3e   : > { %728 = dma.hbm_to_vmem [thread:$0]  (!%p1086_p11), %s1284_s3, 1024, %s1090_s10, [#allocation7], %s985_s25, %s985_s25, %s986_s6  }
  0x3f   : > { %s34_s12 = sadd.s32 1, %s977_s22  ;;  %s41_s13 = sadd.s32 1, %s969_s20 }
  0x40   : > { %p36_p13 = scmp.ge.s32.totalorder %s34_s12, 2  ;;  %p48_p6 = scmp.ne.s32.totalorder %s969_s20, %s965_s19 }
  0x41   : > { %p49_p10 = scmp.eq.s32.totalorder %s981_s23, 0  ;;  %p739_p3 = scmp.lt.s32.totalorder %s981_s23, 2 }
  0x42   : > { %s1310_s12 = smov (%p36_p13, %s34_s12), 0  ;;  %p1154_p7 = por %p1059_p2, %p48_p6 }
  0x43   : > { %p50_p5 = por %p49_p10, %p48_p6  ;;  %s38_s14 = ssub.s32 %s977_s22, %s1310_s12 }
  0x44   : > { %s1297_s8 = scalar_select %p1154_p7, 1, 0 }
  0x45   : > { %s243_s15 = sand.u32 1, %s969_s20   ;;  %p39_p9 = scmp.eq.s32.totalorder %s38_s14, 0 }
  0x46   : > { %s646_s10 = sshll.u32 %s243_s15, 3  ;;  %s647_s25 = sshll.u32 %s977_s22, 7 }
  0x47   : > { %s1163_s6 = scalar_select %p39_p9, %s969_s20, %s41_s13  }
  0x48   : > { %s1168_s24 = scalar_lea.hbm %s1281_s0, %s647_s25  ;;  %s247_s27 = scalar_lea.vmem [#allocation3], %s646_s10 }
  0x49   : > { %s254_s7 = sshll.u32 %s247_s27, 4  ;;  %p1172_p2 = pnand %p739_p3, %p50_p5  ;;  %s1176_s7 = int_to_ptr.vmem [resolvable:$true] %s254_s7 }
  0x4a   : > { %s244_s11 = scalar_lea.sflag [#allocation4], %s243_s15  ;;  %s865_s13 = scalar_lea.hbm %s1168_s24, 128 }
  0x4b   : > { %p866_p11 = scmp.ne.s32.totalorder %s1168_s24, %s865_s13  ;;  %p867_p12 = pneg %p1172_p2 }
  0x4c   : > { %s870_s25 = scalar_lea.hbm %s1281_s0, 256  ;;  %p871_p4 = scmp.lt.u32.totalorder %s1168_s24, %s1281_s0 }
  0x4d   : > { %p868_p0 = pnand %p867_p12, %p866_p11  ;;  %p872_p13 = scmp.lt.u32.totalorder %s870_s25, %s865_s13 }
  0x4e   : > { %p874_p10 = scmp.lt.u32.totalorder %s865_s13, %s1168_s24 }
  0x4f   : > { %p869_p1 = pneg %p868_p0  ;;  %p873_p6 = por %p872_p13, %p871_p4 }
  0x51   : > { %p875_p3 = por %p874_p10, %p873_p6 }
  0x53   : > { %p876_p5 = pnand %p875_p3, %p869_p1 }
  0x55   : > { %879 = shalt.err (!%p876_p5)
}
  0x56   : > { %s880_s15 = scalar_lea.vmem %s1176_s7, 128  ;;  %s987_s27 = smov [#allocation3]  }
  0x57   : > { %p881_p9 = scmp.ne.s32.totalorder %s1176_s7, %s880_s15  ;;  %s885_s14 = sshll.u32 %s987_s27, 4  ;;  %s886_s14 = int_to_ptr.vmem [resolvable:$false] %s885_s14 }
  0x58   : > { %s887_s10 = scalar_lea.vmem %s886_s14, 256  ;;  %p888_p7 = scmp.lt.s32.totalorder %s1176_s7, %s886_s14 }
  0x59   : > { %p883_p11 = pnand %p881_p9, %p867_p12  ;;  %p889_p4 = scmp.lt.s32.totalorder %s887_s10, %s880_s15 }
  0x5b   : > { %p884_p0 = pneg %p883_p11  ;;  %p890_p13 = por %p889_p4, %p888_p7 }
  0x5d   : > { %p891_p6 = pnand %p890_p13, %p884_p0 }
  0x5f   : > { %894 = shalt.err (!%p891_p6)
}
  0x60   : > { %732 = dma.hbm_to_vmem [thread:$0]  (!%p1172_p2), %s1168_s24, 128, %s1176_s7, %s244_s11  }
  0x61   : > { %263 = sbr.rel (%p1075_p8) target bundleno = 581 (0x245), region = 40  ;;  %s1206_s13 = sand.u32 (!%p1075_p8), 1, %s965_s19  }
  0x62   : > { %s649_s25 = sshll.u32 (!%p1075_p8), %s1206_s13, 3  ;;  %s266_s16 = scalar_lea.sflag (!%p1075_p8), [#allocation4], %s1206_s13 }
  0x63   : > { %s269_s17 = scalar_lea.vmem (!%p1075_p8), [#allocation3], %s649_s25  ;;  %p1299_p7 = scmp.ne.s32.totalorder (!%p1075_p8), %s1293_s28, 0 }
  0x68   : > { %948 = dma.done.wait (%p1299_p7), %s266_s16, 128  }
  0x69   : > { %950 = vsyncadd (%p1299_p7), %s266_s16, 4294967168  ;;  %p1300_p2 = scmp.ne.s32.totalorder %s1291_s26, 0 }
  0x6b   : > { %952 = dma.done.wait (%p1300_p2), [#allocation7], 1280  }
  0x6c   : > { %954 = vsyncadd (%p1300_p2), [#allocation7], 4294966016  ;;  %v988_v0 = vmov 0.0   ;;  %vm989_vm0 = vmmov 0   ;;  %v797_v1 = vld [vmem:[#allocation6] sm:$0xff]   ;;  %v798_v2 = vld [vmem:[#allocation6 + $0x8] sm:$0xff]  }
  0x6d   : > { %682 = vmatprep.subr.bf16.mxu0 %v988_v0  ;;  %686 = vmatprep.mubr.msk.bf16.mxu0 %vm989_vm0, %v988_v0  ;;  %v317_v3 = vld [vmem:[%s269_s17] sm:$0xff]  ;;  %vm342_vm1 = vcmask 261120   ;;  %v801_v7 = vld [vmem:[#allocation8 + $0x10] sm:$0xff]   ;;  %v802_v8 = vld [vmem:[#allocation8 + $0x18] sm:$0xff]   ;;  %s667_s7 = sshll.u32 %s973_s21, 7  ;;  %s306_s9 = scalar_lea.vmem [#allocation9], %s649_s25 }
  0x6e   : > { %690 = vmatprep.subr.bf16.mxu1 %v988_v0  ;;  %706 = vmatprep.mubr.msk.bf16.mxu1 %vm989_vm0, %v988_v0  ;;  %v799_v4 = vld [vmem:[#allocation8] sm:$0xff]   ;;  %v318_v5 = vpack.c.bf16 %v317_v3, %v317_v3  ;;  %v800_v6 = vld [vmem:[#allocation8 + $0x8] sm:$0xff]   ;;  %v805_v11 = vld [vmem:[#allocation8 + $0x30] sm:$0xff]   ;;  %s526_s11 = sshll.u32 %s306_s9, 4  ;;  %s1232_s14 = scalar_lea.hbm %s1286_s5, %s667_s7  ;;  %s1234_s11 = int_to_ptr.vmem [resolvable:$true] %s526_s11 }
  0x6f   : > { %683 = vmatpush3.bf16.msra.mxu0 %v797_v1  ;;  %691 = vmatpush3.bf16.msra.mxu1 %v799_v4  ;;  %v803_v9 = vld [vmem:[#allocation8 + $0x20] sm:$0xff]   ;;  %v804_v10 = vld [vmem:[#allocation8 + $0x28] sm:$0xff]   ;;  %v806_v12 = vld [vmem:[#allocation8 + $0x38] sm:$0xff]   ;;  %s513_s10 = scalar_lea.sflag [#allocation5], %s1206_s13  ;;  %s895_s16 = scalar_lea.vmem %s1234_s11, 128 }
  0x70   : > { %684 = vmatprep.subr.bf16.mxu0 %v988_v0  ;;  %692 = vmatprep.subr.bf16.mxu1 %v988_v0  ;;  %v653_v13 = vld [vmem:[%s1283_s2] ss:$0 sm:$0xff]  ;;  %p896_p8 = scmp.ne.s32.totalorder %s1234_s11, %s895_s16  ;;  %p1301_p12 = scmp.ne.s32.totalorder %s1297_s8, 0 }
  0x71   : > { %v665_v21 = vld [vmem:[%s1285_s4] ss:$0 sm:$0xff]  ;;  %s990_s21 = smov [#allocation9]  }
  0x72   : > { %p897_p1 = pnand %p896_p8, %p1301_p12  ;;  %s899_s25 = sshll.u32 %s990_s21, 4  ;;  %s900_s25 = int_to_ptr.vmem [resolvable:$false] %s899_s25 }
  0x73   : > { %685 = vmatpush3.bf16.msra.mxu0 %v798_v2  ;;  %693 = vmatpush3.bf16.msra.mxu1 %v800_v6  ;;  %s901_s17 = scalar_lea.vmem %s900_s25, 256  ;;  %p902_p3 = scmp.lt.s32.totalorder %s1234_s11, %s900_s25 }
  0x74   : > { %694 = vmatprep.subr.bf16.mxu1 %v988_v0  ;;  %p898_p10 = pneg %p897_p1  ;;  %p903_p5 = scmp.lt.s32.totalorder %s901_s17, %s895_s16 }
  0x76   : > { %687 = vmatmul.mubr.msk.bf16.vlgmr.msra.gmra.mrb[0].mxu0 %vm342_vm1, %v318_v5  ;;  %p904_p9 = por %p903_p5, %p902_p3 }
  0x77   : > { %695 = vmatpush3.bf16.msra.mxu1 %v801_v7 }
  0x78   : > { %696 = vmatprep.subr.bf16.mxu1 %v988_v0  ;;  %p905_p11 = pnand %p904_p9, %p898_p10 }
  0x7b   : > { %697 = vmatpush3.bf16.msra.mxu1 %v802_v8 }
  0x7c   : > { %698 = vmatprep.subr.bf16.mxu1 %v988_v0 }
  0x7f   : > { %699 = vmatpush3.bf16.msra.mxu1 %v803_v9 }
  0x80   : > { %700 = vmatprep.subr.bf16.mxu1 %v988_v0 }
  0x83   : > { %701 = vmatpush3.bf16.msra.mxu1 %v804_v10 }
  0x84   : > { %702 = vmatprep.subr.bf16.mxu1 %v988_v0 }
  0x87   : > { %703 = vmatpush3.bf16.msra.mxu1 %v805_v11 }
  0x88   : > { %704 = vmatprep.subr.bf16.mxu1 %v988_v0 }
  0x8b   : > { %705 = vmatpush3.bf16.msra.mxu1 %v806_v12 }
 0x149   : > { %v380_v14 = vpop.f32.mrb[0].mxu0 }
 0x14a   : > { %v381_v15 = vadd.f32 %v653_v13, %v380_v14  ;;  %v688_v16 = vpop.f32.mrb[1].mxu0 }
 0x14b   : > { %v383_v17 = vpop.f32.mrb[2].mxu0 }
 0x14c   : > { %v386_v18 = vmax.f32 %v381_v15, 0.0  ;;  %v689_v19 = vpop.f32.mrb[3].mxu0 }
 0x14e   : > { %v388_v20 = vpack.c.bf16 %v386_v18, %v386_v18 }
 0x150   : > { %707 = vmatmul.mubr.bf16.vlgmr.msra.gmra.mrb[0].mxu1 %v388_v20 }
 0x223   : > { %v487_v22 = vpop.f32.mrb[0].mxu1 }
 0x224   : > { %v506_v23 = vadd.f32 %v665_v21, %v487_v22  ;;  %v708_v24 = vpop.f32.mrb[1].mxu1 }
 0x225   : > { %v490_v25 = vpop.f32.mrb[2].mxu1 }
 0x226   : > { %v507_v26 = vmul.f32 0.5, %v506_v23  ;;  %v709_v27 = vpop.f32.mrb[3].mxu1 }
 0x228   : > { %807 = vtanh.f32 %v507_v26 }
 0x232   : > { %v808_v28 = vpop.eup %807 }
 0x233   : > { %v509_v29 = vmul.f32 0.5, %v808_v28 }
 0x235   : > { %v510_v30 = vadd.f32 0.5, %v509_v29 }
 0x237   : > { %511 = vst [vmem:[%s306_s9] sm:$0xff] %v510_v30 }
 0x238   : > { %908 = shalt.err (!%p905_p11)
}
 0x239   : > { %s909_s13 = scalar_lea.hbm %s1232_s14, 128  ;;  %s913_s30 = scalar_lea.hbm %s1286_s5, 256 }
 0x23a   : > { %p910_p0 = scmp.ne.s32.totalorder %s1232_s14, %s909_s13  ;;  %p914_p6 = scmp.lt.u32.totalorder %s1232_s14, %s1286_s5 }
 0x23b   : > { %p915_p7 = scmp.lt.u32.totalorder %s913_s30, %s909_s13  ;;  %p917_p8 = scmp.lt.u32.totalorder %s909_s13, %s1232_s14 }
 0x23c   : > { %p911_p4 = pnand %p910_p0, %p1301_p12 }
 0x23d   : > { %p916_p2 = por %p915_p7, %p914_p6 }
 0x23e   : > { %p912_p13 = pneg %p911_p4 }
 0x23f   : > { %p918_p1 = por %p917_p8, %p916_p2 }
 0x241   : > { %p919_p10 = pnand %p918_p1, %p912_p13 }
 0x243   : > { %922 = shalt.err (!%p919_p10)
}
 0x244   : > { %720 = dma.vmem_to_hbm [thread:$0]  (%p1301_p12), %s1234_s11, 128, %s1232_s14, %s513_s10  }
 0x245 PF: > { %s538_s9 = sand.u32 1, %s961_s18   ;;  %p1302_p3 = scmp.ne.s32.totalorder %s1294_s29, 0 }
 0x246   : > { %p1303_p5 = scmp.ge.s32.totalorder %s981_s23, 2  ;;  %s539_s15 = scalar_lea.sflag [#allocation5], %s538_s9 }
 0x248   : > { %p734_p9 = pnand %p1303_p5, %p1302_p3 }
 0x24a   : > { %956 = dma.done.wait (!%p734_p9), %s539_s15, 128  }
 0x24b   : > { %958 = vsyncadd (!%p734_p9), %s539_s15, 4294967168  ;;  %s22_s23 = sadd.s32 1, %s981_s23   ;;  %s1304_s18 = smov %s965_s19 }
 0x24c   : > { %p19_p11 = scmp.ge.s32.totalorder %s22_s23, 4   ;;  %s1305_s19 = smov %s969_s20 }
 0x24d   : > { %s1306_s20 = smov %s1163_s6  ;;  %s1307_s21 = smov %s977_s22 }
 0x24e   : > { %s1308_s22 = smov %s1310_s12  ;;  %21 = sbr.rel (!%p19_p11) target bundleno = 7 (0x7), region = 106 }
 0x255   :  { %544 = vsyncpa [#allocation4], 1 }
 0x256   :  { %546 = vsyncpa [#allocation4 + $0x1], 1 }
 0x257   :  { %547 = vsyncpa [#allocation7], 1 }
 0x258   :  { %548 = vsyncpa [#allocation5], 1 }
 0x259   :  { %550 = vsyncpa [#allocation5 + $0x1], 1 }

</bundles_post_ra>
